<compile_context>
chip_gen: v7x
topology: tpu7x:2x2x1
jax: 0.10.0
libtpu: 0.0.40
codegen_flags: <defaults>
</compile_context>

<pallas_src>
import math

import jax
import jax.numpy as jnp
from jax.experimental import pallas as pl
from jax.experimental.pallas import tpu as pltpu


def _highway_kernel(x_ref, w_ref, b_ref, o_ref):
    """Fused Highway block on one (TB, D) row tile.

    x_ref: (TB, D)   input rows
    w_ref: (D, 2D)   [proj | transform] weights, pre-transposed, bf16, resident
    b_ref: (1, 2D)   [proj | transform] biases, resident
    o_ref: (TB, D)   gated output
    """
    d = o_ref.shape[-1]
    x = x_ref[...]

    # One lane-dense MXU matmul (bf16 operands, f32 accumulation).
    both = jnp.dot(x.astype(w_ref.dtype), w_ref[...],
                   preferred_element_type=jnp.float32)
    both = both + b_ref[...].astype(jnp.float32)

    proj_result = jnp.maximum(both[:, :d], 0.0)     # ReLU     (VPU)
    proj_gate = jax.nn.sigmoid(both[:, d:])         # sigmoid  (EUP)

    xf = x.astype(jnp.float32)
    # out = g*p + (1-g)*x  ==  x + g*(p - x)   (one fewer multiply)
    o_ref[...] = (xf + proj_gate * (proj_result - xf)).astype(o_ref.dtype)


def _round_up(x, m):
    return (x + m - 1) // m * m


def _choose_tb(n, row_tile):
    """Row tile: multiple of 8 (sublane), capped at row_tile; prefer >=2 grid
    steps so the 'parallel' axis can be sharded across TensorCores (v7x)."""
    if n <= 8:
        return 8
    tb = min(row_tile, _round_up(n, 8))
    if pl.cdiv(n, tb) < 2:
        tb = _round_up(pl.cdiv(n, 2), 8)
    return tb


def highway_forward(x, params, *, row_tile=512):
    """Applies the Highway block to x of shape (..., D)."""
    w_cat, b_cat = params
    d = x.shape[-1]
    assert w_cat.shape == (d, 2 * d), (w_cat.shape, d)

    orig_shape = x.shape
    x2 = x.reshape(-1, d)
    n = x2.shape[0]

    tb = _choose_tb(n, row_tile)
    grid = (pl.cdiv(n, tb),)          # partial last tile handled by Pallas

    b2 = b_cat.reshape(1, 2 * d)

    # VMEM budget: (double-buffered) weights + biases + x/out tiles + headroom,
    # capped at 64 MiB so the limit is valid on v7x too.
    w_bytes = 2 * w_cat.size * w_cat.dtype.itemsize
    b_bytes = 2 * b2.size * b2.dtype.itemsize
    tile_bytes = 2 * 2 * tb * d * x2.dtype.itemsize        # x + out, 2 buffers
    vmem_limit = int(min(64 * 2**20,
                         max(16 * 2**20,
                             w_bytes + b_bytes + tile_bytes + 4 * 2**20)))

    out = pl.pallas_call(
        _highway_kernel,
        out_shape=jax.ShapeDtypeStruct((n, d), x.dtype),
        grid_spec=pltpu.PrefetchScalarGridSpec(
            num_scalar_prefetch=0,
            grid=grid,
            in_specs=[
                pl.BlockSpec((tb, d), lambda i: (i, 0)),       # x rows
                pl.BlockSpec((d, 2 * d), lambda i: (0, 0)),    # fused W (resident)
                pl.BlockSpec((1, 2 * d), lambda i: (0, 0)),    # fused bias (resident)
            ],
            out_specs=pl.BlockSpec((tb, d), lambda i: (i, 0)),
        ),
        compiler_params=pltpu.CompilerParams(
            dimension_semantics=("parallel",),
            vmem_limit_bytes=vmem_limit),
    )(x2, w_cat, b2)

    return out.reshape(orig_shape)


def init_params(key, input_size, dtype=jnp.float32, mxu_dtype=jnp.bfloat16):
    """Matches PyTorch nn.Linear init: U(-1/sqrt(D), 1/sqrt(D)) for weights and
    biases, then transform.bias filled with -2.0. Weights are pre-transposed to
    (in, out), concatenated to (D, 2D) = [proj | transform], and cast once to
    the MXU dtype (bf16 by default). Biases are concatenated to (2D,)."""
    bound = 1.0 / math.sqrt(input_size)
    k1, k2, k3 = jax.random.split(key, 3)
    w_proj = jax.random.uniform(k1, (input_size, input_size), jnp.float32,
                                minval=-bound, maxval=bound)   # (out, in)
    b_proj = jax.random.uniform(k2, (input_size,), jnp.float32,
                                minval=-bound, maxval=bound)
    w_trans = jax.random.uniform(k3, (input_size, input_size), jnp.float32,
                                 minval=-bound, maxval=bound)  # (out, in)
    b_trans = jnp.full((input_size,), -2.0, jnp.float32)

    w_cat = jnp.concatenate([w_proj.T, w_trans.T], axis=1).astype(mxu_dtype)
    b_cat = jnp.concatenate([b_proj, b_trans], axis=0).astype(dtype)
    return w_cat, b_cat


if __name__ == "__main__":
    batch, seq, d = 2, 8, 128   # lane-dense feature dim; 16 total rows
    dtype = jnp.float32

    key = jax.random.PRNGKey(0)
    kx, kp = jax.random.split(key)

    x = jax.random.normal(kx, (batch, seq, d), dtype)
    params = init_params(kp, d, dtype=dtype)

    out = highway_forward(x, params)
    jax.block_until_ready(out)

    # Pure-JAX reference of the same math (f32 math on the stored params).
    def ref_forward(xx, prm):
        w_cat, b_cat = prm
        h = xx @ w_cat.astype(jnp.float32) + b_cat.astype(jnp.float32)
        proj_result = jax.nn.relu(h[..., :d])
        proj_gate = jax.nn.sigmoid(h[..., d:])
        return proj_gate * proj_result + (1.0 - proj_gate) * xx

    out_ref = ref_forward(x, params).astype(dtype)
    assert out.shape == x.shape
    max_err = float(jnp.max(jnp.abs(out - out_ref)))
    # bf16 MXU operands vs f32 reference -> loosened tolerance.
    assert jnp.allclose(out, out_ref, atol=2e-2, rtol=2e-2), max_err

    print("KERNEL_OK")
</pallas_src>

<mosaic_0001>
module attributes {stable_mosaic.version = 11 : i64} {
  func.func @_highway_kernel(%arg0: i32, %arg1: memref<8x128xf32, #tpu.memory_space<vmem>>, %arg2: memref<128x256xbf16, #tpu.memory_space<vmem>>, %arg3: memref<1x256xf32, #tpu.memory_space<vmem>>, %arg4: memref<8x128xf32, #tpu.memory_space<vmem>>) attributes {dimension_semantics = [#tpu.dimension_semantics<parallel>], iteration_bounds = array<i64: 2>, scalar_prefetch = 0 : i64, scratch_operands = 0 : i64, tpu.core_type = #tpu.core_type<tc>, window_params = [{transform_indices = @transform_0, window_bounds = array<i64: 8, 128>}, {pipeline_mode = #tpu.pipeline_mode<synchronous>, transform_indices = @transform_1, window_bounds = array<i64: 128, 256>}, {pipeline_mode = #tpu.pipeline_mode<synchronous>, transform_indices = @transform_2, window_bounds = array<i64: 1, 256>}, {transform_indices = @transform_3, window_bounds = array<i64: 8, 128>}]} {
    %c0 = arith.constant 0 : index
    %c0_0 = arith.constant 0 : index
    %0 = vector.load %arg1[%c0, %c0_0] : memref<8x128xf32, #tpu.memory_space<vmem>>, vector<8x128xf32>
    %1 = arith.truncf %0 : vector<8x128xf32> to vector<8x128xbf16>
    %c0_1 = arith.constant 0 : index
    %c0_2 = arith.constant 0 : index
    %2 = vector.load %arg2[%c0_1, %c0_2] : memref<128x256xbf16, #tpu.memory_space<vmem>>, vector<128x256xbf16>
    %cst = arith.constant dense<0.000000e+00> : vector<8x256xf32>
    %3 = tpu.matmul %1, %2, %cst {dimension_numbers = #tpu.dot_dimension_numbers<[1], [0], [0], [1], [0, 0, 1, 1], [], []>} : vector<8x128xbf16>, vector<128x256xbf16>, vector<8x256xf32> -> vector<8x256xf32>
    %c0_3 = arith.constant 0 : index
    %c0_4 = arith.constant 0 : index
    %4 = vector.load %arg3[%c0_3, %c0_4] : memref<1x256xf32, #tpu.memory_space<vmem>>, vector<1x256xf32>
    %5 = vector.broadcast %4 : vector<1x256xf32> to vector<8x256xf32>
    %6 = arith.addf %3, %5 : vector<8x256xf32>
    %7 = vector.extract_strided_slice %6 {offsets = [0, 0], sizes = [8, 128], strides = [1, 1]} : vector<8x256xf32> to vector<8x128xf32>
    %cst_5 = arith.constant 0.000000e+00 : f32
    %8 = vector.broadcast %cst_5 : f32 to vector<8x128xf32>
    %9 = arith.maximumf %7, %8 : vector<8x128xf32>
    %10 = vector.extract_strided_slice %6 {offsets = [0, 128], sizes = [8, 128], strides = [1, 1]} : vector<8x256xf32> to vector<8x128xf32>
    %11 = arith.negf %10 : vector<8x128xf32>
    %12 = math.exp %11 : vector<8x128xf32>
    %cst_6 = arith.constant 1.000000e+00 : f32
    %13 = vector.broadcast %cst_6 : f32 to vector<8x128xf32>
    %14 = arith.addf %13, %12 : vector<8x128xf32>
    %15 = arith.divf %13, %14 : vector<8x128xf32>
    %16 = arith.subf %9, %0 : vector<8x128xf32>
    %17 = arith.mulf %15, %16 : vector<8x128xf32>
    %18 = arith.addf %0, %17 : vector<8x128xf32>
    %c0_7 = arith.constant 0 : index
    %c0_8 = arith.constant 0 : index
    %19 = vector.load %arg4[%c0_7, %c0_8] : memref<8x128xf32, #tpu.memory_space<vmem>>, vector<8x128xf32>
    tpu.vector_store %arg4[%c0_7, %c0_8], %18 {strides = array<i32>} : memref<8x128xf32, #tpu.memory_space<vmem>>, vector<8x128xf32>,
    return
  }
  func.func @transform_0(%arg0: i32) -> (i32, i32) {
    %c0_i32 = arith.constant 0 : i32
    %c0_i32_0 = arith.constant 0 : i32
    return %arg0, %c0_i32 : i32, i32
  }
  func.func @transform_1(%arg0: i32) -> (i32, i32) {
    %c0_i32 = arith.constant 0 : i32
    %c0_i32_0 = arith.constant 0 : i32
    %c0_i32_1 = arith.constant 0 : i32
    return %c0_i32, %c0_i32_0 : i32, i32
  }
  func.func @transform_2(%arg0: i32) -> (i32, i32) {
    %c0_i32 = arith.constant 0 : i32
    %c0_i32_0 = arith.constant 0 : i32
    %c0_i32_1 = arith.constant 0 : i32
    return %c0_i32, %c0_i32_0 : i32, i32
  }
  func.func @transform_3(%arg0: i32) -> (i32, i32) {
    %c0_i32 = arith.constant 0 : i32
    %c0_i32_0 = arith.constant 0 : i32
    return %arg0, %c0_i32 : i32, i32
  }
}

</mosaic_0001>

<bundles_post_ra>
// kernel: tpu_custom_call.1
= control target key start
LH: loop header
LB: loop body
LE: loop exit
PB: predicated region body
PF: predicated region fallthrough
CT: control target
= control target key end

     0   :  { %8 = vsyncpa [#allocation3], 0  ;;  %s939_s0 = inlined_call_operand.hbm [shape: f32[16,128], index: 0, kind: input, shape index: {}]   ;;  %s940_s1 = inlined_call_operand.hbm [shape: bf16[128,256], index: 1, kind: input, shape index: {}]   ;;  %s941_s2 = inlined_call_operand.vmem [shape: f32[1,256], index: 2, kind: input, shape index: {}]   ;;  %s942_s3 = inlined_call_operand.hbm [shape: f32[16,128], index: 3, kind: output, shape index: {}]  }
   0x1   :  { %10 = vsyncpa [#allocation3 + $0x1], 0 }
   0x2   :  { %11 = vsyncpa [#allocation6], 0 }
   0x3   :  { %12 = vsyncpa [#allocation4], 0 }
   0x4   :  { %14 = vsyncpa [#allocation4 + $0x1], 0  ;;  %s733_s12 = smov 0   ;;  %s735_s13 = smov 0  }
   0x5   :  { %s737_s14 = smov 0   ;;  %s739_s15 = smov 0  }
   0x6 LB: > { %s754_s16 = sadd.s32 4294967295, %s705_s15   ;;  %s458_s17 = sadd.s32 4294967294, %s705_s15   ;;  %s705_s15 = sphi %s739_s15, %s962_s15   ;;  %s701_s14 = sphi %s737_s14, %s961_s14   ;;  %s697_s13 = sphi %s735_s13, %s960_s13   ;;  %s693_s12 = sphi %s733_s12, %s959_s12  }
   0x7   : > { %p40_p0 = scmp.ne.s32.totalorder %s697_s13, %s693_s12  ;;  %p943_p1 = scmp.eq.s32.totalorder %s754_s16, 0 }
   0x8   : > { %p112_p3 = scmp.eq.s32.totalorder %s458_s17, 1  ;;  %p459_p5 = scmp.ge.s32.totalorder %s705_s15, 1 }
   0x9   : > { %p763_p4 = por %p943_p1, %p40_p0  ;;  %p119_p7 = scmp.lt.s32.totalorder %s705_s15, 3 }
   0xa   : > { %p768_p6 = por %p112_p3, %p40_p0  ;;  %s707_s21 = smov [#allocation5]  }
   0xb   : > { %s946_s18 = scalar_select %p763_p4, 1, 0 }
   0xc   : > { %s947_s19 = scalar_select %p768_p6, 1, 0 }
   0xd   : > { %p773_p8 = pnand %p459_p5, %p119_p7  ;;  %s131_s22 = sshll.u32 %s707_s21, 4  ;;  %s777_s22 = int_to_ptr.vmem [resolvable:$true] %s131_s22 }
   0xe   : > { %s789_s24 = sadd.s32 1, %s705_s15   ;;  %s27_s25 = sadd.s32 1, %s701_s14 }
   0xf   : > { %s948_s20 = scalar_select %p773_p8, 1, 0 }
  0x10   : > { %p497_p9 = pneg %p773_p8  ;;  %s24_s26 = ssub.s32 %s705_s15, %s789_s24 }
  0x11   : > { %s577_s29 = scalar_lea.hbm %s940_s1, 2048 }
  0x12   : > { %p784_p11 = pnand %p497_p9, %p943_p1  ;;  %p578_p12 = scmp.ne.s32.totalorder %s940_s1, %s577_s29 }
  0x13   : > { %p584_p5 = scmp.lt.u32.totalorder %s577_s29, %s940_s1 }
  0x14   : > { %p579_p13 = pneg %p784_p11 }
  0x16   : > { %p580_p0 = pnand %p579_p13, %p578_p12 }
  0x18   : > { %p581_p3 = pneg %p580_p0 }
  0x1a   : > { %p586_p7 = pnand %p584_p5, %p581_p3 }
  0x1c   : > { %589 = shalt.err (!%p586_p7)
}
  0x1d   : > { %s590_s7 = scalar_lea.vmem %s777_s22, 2048  ;;  %p598_p2 = scmp.lt.s32.totalorder %s777_s22, %s777_s22 }
  0x1e   : > { %p591_p9 = scmp.ne.s32.totalorder %s777_s22, %s590_s7  ;;  %p599_p6 = scmp.lt.s32.totalorder %s590_s7, %s590_s7 }
  0x20   : > { %p593_p10 = pnand %p591_p9, %p579_p13  ;;  %p600_p4 = por %p599_p6, %p598_p2 }
  0x22   : > { %p594_p1 = pneg %p593_p10 }
  0x24   : > { %p601_p8 = pnand %p600_p4, %p594_p1 }
  0x26   : > { %604 = shalt.err (!%p601_p8)
}
  0x27   : > { %s708_s8 = smov 128   ;;  %s709_s9 = smov 8  }
  0x28   : > { %500 = dma.hbm_to_vmem [thread:$0]  (!%p784_p11), %s940_s1, 2048, %s777_s22, [#allocation6], %s708_s8, %s708_s8, %s709_s9  }
  0x29   : > { %p25_p2 = scmp.eq.s32.totalorder %s24_s26, 0  ;;  %p34_p1 = scmp.ne.s32.totalorder %s701_s14, %s697_s13 }
  0x2a   : > { %p35_p4 = scmp.eq.s32.totalorder %s705_s15, 0  ;;  %p510_p6 = scmp.lt.s32.totalorder %s705_s15, 2 }
  0x2b   : > { %s820_s17 = scalar_select %p25_p2, %s701_s14, %s27_s25  }
  0x2c   : > { %p36_p8 = por %p35_p4, %p34_p1  ;;  %p950_p10 = scmp.eq.s32.totalorder %s754_s16, 1 }
  0x2d   : > { %s148_s27 = sand.u32 1, %s701_s14   ;;  %s463_s28 = sshll.u32 %s705_s15, 7 }
  0x2e   : > { %p824_p12 = por %p950_p10, %p34_p1  ;;  %s462_s29 = sshll.u32 %s148_s27, 3 }
  0x2f   : > { %s833_s4 = scalar_lea.hbm %s939_s0, %s463_s28  ;;  %s152_s22 = scalar_lea.vmem [#allocation2], %s462_s29 }
  0x30   : > { %s159_s25 = sshll.u32 %s152_s22, 4  ;;  %p835_p11 = pnand %p510_p6, %p36_p8  ;;  %s839_s25 = int_to_ptr.vmem [resolvable:$true] %s159_s25 }
  0x31   : > { %s149_s5 = scalar_lea.sflag [#allocation3], %s148_s27  ;;  %s605_s6 = scalar_lea.hbm %s833_s4, 128 }
  0x32   : > { %p606_p13 = scmp.ne.s32.totalorder %s833_s4, %s605_s6  ;;  %p607_p0 = pneg %p835_p11 }
  0x33   : > { %s610_s9 = scalar_lea.hbm %s939_s0, 256  ;;  %p611_p7 = scmp.lt.u32.totalorder %s833_s4, %s939_s0 }
  0x34   : > { %p608_p3 = pnand %p607_p0, %p606_p13  ;;  %p612_p9 = scmp.lt.u32.totalorder %s610_s9, %s605_s6 }
  0x35   : > { %p614_p1 = scmp.lt.u32.totalorder %s605_s6, %s833_s4 }
  0x36   : > { %p609_p5 = pneg %p608_p3  ;;  %p613_p2 = por %p612_p9, %p611_p7 }
  0x38   : > { %p615_p4 = por %p614_p1, %p613_p2 }
  0x3a   : > { %p616_p6 = pnand %p615_p4, %p609_p5 }
  0x3c   : > { %619 = shalt.err (!%p616_p6)
}
  0x3d   : > { %s620_s27 = scalar_lea.vmem %s839_s25, 128  ;;  %s710_s28 = smov [#allocation2]  }
  0x3e   : > { %p621_p8 = scmp.ne.s32.totalorder %s839_s25, %s620_s27  ;;  %s625_s29 = sshll.u32 %s710_s28, 4  ;;  %s626_s29 = int_to_ptr.vmem [resolvable:$false] %s625_s29 }
  0x3f   : > { %s627_s23 = scalar_lea.vmem %s626_s29, 256  ;;  %p628_p3 = scmp.lt.s32.totalorder %s839_s25, %s626_s29 }
  0x40   : > { %p623_p10 = pnand %p621_p8, %p607_p0  ;;  %p629_p7 = scmp.lt.s32.totalorder %s627_s23, %s620_s27 }
  0x42   : > { %p624_p13 = pneg %p623_p10  ;;  %p630_p9 = por %p629_p7, %p628_p3 }
  0x44   : > { %p631_p2 = pnand %p630_p9, %p624_p13 }
  0x46   : > { %634 = shalt.err (!%p631_p2)
}
  0x47   : > { %504 = dma.hbm_to_vmem [thread:$0]  (!%p835_p11), %s833_s4, 128, %s839_s25, %s149_s5  }
  0x48   : > { %p953_p5 = scmp.ne.s32.totalorder %s948_s20, 0 }
  0x49   : > { %s869_s30 = sand.u32 (!%p953_p5), 1, %s697_s13   ;;  %p954_p0 = scmp.ne.s32.totalorder (!%p953_p5), %s946_s18, 0 }
  0x4a   : > { %168 = sbr.rel (%p953_p5) target bundleno = 377 (0x179), region = 32  ;;  %s465_s22 = sshll.u32 (!%p953_p5), %s869_s30, 3 }
  0x4b   : > { %s171_s6 = scalar_lea.sflag (!%p953_p5), [#allocation3], %s869_s30  ;;  %s875_s7 = scalar_lea.vmem (!%p953_p5), [#allocation2], %s465_s22 }
  0x51   : > { %680 = dma.done.wait (%p954_p0), %s171_s6, 128  }
  0x52   : > { %682 = vsyncadd (%p954_p0), %s171_s6, 4294967168  ;;  %p955_p11 = scmp.eq.s32.totalorder %s754_s16, 0 }
  0x54   : > { %684 = dma.done.wait (%p955_p11), [#allocation6], 2048   ;;  %p956_p1 = pmov %p955_p11 }
  0x55   : > { %v711_v0 = vmov 0   ;;  %v549_v1 = vld [vmem:[#allocation5 + $0x4] ss:$8 sps:$4 sm:$0xff]   ;;  %v551_v2 = vld [vmem:[#allocation5] ss:$8 sps:$4 sm:$0xff]   ;;  %v202_v17 = vld [vmem:[%s875_s7] sm:$0xff]  ;;  %v222_v19 = vlaneseq }
  0x56   : > { %686 = vsyncadd (%p956_p1), [#allocation6], 4294965248  ;;  %344 = vmatprep.mubr.bf16.mxu0 %v711_v0  ;;  %312 = vmatprep.subr.bf16.mxu0 %v549_v1  ;;  %v552_v3 = vld [vmem:[#allocation5 + $0x14] ss:$8 sps:$4 sm:$0xff]   ;;  %v554_v4 = vld [vmem:[#allocation5 + $0x10] ss:$8 sps:$4 sm:$0xff]   ;;  %v203_v18 = vpack.c.bf16 %v202_v17, %v202_v17 }
  0x57   : > { %313 = vmatpush1.bf16.msra.mxu0 %v551_v2  ;;  %v555_v5 = vld [vmem:[#allocation5 + $0x24] ss:$8 sps:$4 sm:$0xff]   ;;  %v557_v6 = vld [vmem:[#allocation5 + $0x20] ss:$8 sps:$4 sm:$0xff]   ;;  %v558_v7 = vld [vmem:[#allocation5 + $0x34] ss:$8 sps:$4 sm:$0xff]  }
  0x58   : > { %314 = vmatprep.subr.bf16.mxu0 %v552_v3  ;;  %v560_v8 = vld [vmem:[#allocation5 + $0x30] ss:$8 sps:$4 sm:$0xff]   ;;  %v561_v9 = vld [vmem:[#allocation5 + $0x44] ss:$8 sps:$4 sm:$0xff]   ;;  %v563_v10 = vld [vmem:[#allocation5 + $0x40] ss:$8 sps:$4 sm:$0xff]  }
  0x59   : > { %v564_v11 = vld [vmem:[#allocation5 + $0x54] ss:$8 sps:$4 sm:$0xff]   ;;  %v566_v12 = vld [vmem:[#allocation5 + $0x50] ss:$8 sps:$4 sm:$0xff]   ;;  %v567_v13 = vld [vmem:[#allocation5 + $0x64] ss:$8 sps:$4 sm:$0xff]  }
  0x5a   : > { %v569_v14 = vld [vmem:[#allocation5 + $0x60] ss:$8 sps:$4 sm:$0xff]   ;;  %v570_v15 = vld [vmem:[#allocation5 + $0x74] ss:$8 sps:$4 sm:$0xff]   ;;  %v572_v16 = vld [vmem:[#allocation5 + $0x70] ss:$8 sps:$4 sm:$0xff]  }
  0x5b   : > { %315 = vmatpush1.bf16.msra.mxu0 %v554_v4  ;;  %v223_v20 = vshrl.u32 %v222_v19, 7  ;;  %v220_v22 = vld [vmem:[%s941_s2] sm:$0x3]  ;;  %s486_s4 = sshll.u32 %s754_s16, 7  ;;  %s200_s25 = scalar_lea.vmem [#allocation7], %s465_s22 }
  0x5c   : > { %316 = vmatprep.subr.bf16.mxu0 %v555_v5  ;;  %s378_s26 = sshll.u32 %s200_s25, 4  ;;  %s895_s9 = scalar_lea.hbm %s942_s3, %s486_s4  ;;  %s897_s26 = int_to_ptr.vmem [resolvable:$true] %s378_s26 }
  0x5d   : > { %v228_v21 = vsub.s32 1, %v223_v20  ;;  %v224_v30 = vsub.s32 0, %v223_v20  ;;  %s365_s10 = scalar_lea.sflag [#allocation4], %s869_s30  ;;  %s635_s11 = scalar_lea.vmem %s897_s26, 128 }
  0x5e   : > { %p636_p4 = scmp.ne.s32.totalorder %s897_s26, %s635_s11  ;;  %s712_s16 = smov [#allocation7]  }
  0x5f   : > { %317 = vmatpush1.bf16.msra.mxu0 %v557_v6  ;;  %v229_v23 = vrot.slane %v220_v22, %v228_v21  ;;  %v225_v32 = vrot.slane %v220_v22, %v224_v30  ;;  %s639_s27 = sshll.u32 %s712_s16, 4  ;;  %s640_s27 = int_to_ptr.vmem [resolvable:$false] %s639_s27 }
  0x60   : > { %318 = vmatprep.subr.bf16.mxu0 %v558_v7  ;;  %p637_p6 = pnand %p636_p4, %p824_p12  ;;  %s641_s28 = scalar_lea.vmem %s640_s27, 256 }
  0x61   : > { %p642_p10 = scmp.lt.s32.totalorder %s897_s26, %s640_s27  ;;  %p643_p13 = scmp.lt.s32.totalorder %s641_s28, %s635_s11 }
  0x62   : > { %p638_p8 = pneg %p637_p6 }
  0x63   : > { %319 = vmatpush1.bf16.msra.mxu0 %v560_v8  ;;  %p644_p3 = por %p643_p13, %p642_p10 }
  0x64   : > { %320 = vmatprep.subr.bf16.mxu0 %v561_v9 }
  0x65   : > { %p645_p7 = pnand %p644_p3, %p638_p8 }
  0x67   : > { %321 = vmatpush1.bf16.msra.mxu0 %v563_v10 }
  0x68   : > { %322 = vmatprep.subr.bf16.mxu0 %v564_v11 }
  0x6b   : > { %323 = vmatpush1.bf16.msra.mxu0 %v566_v12 }
  0x6c   : > { %324 = vmatprep.subr.bf16.mxu0 %v567_v13 }
  0x6f   : > { %325 = vmatpush1.bf16.msra.mxu0 %v569_v14 }
  0x70   : > { %326 = vmatprep.subr.bf16.mxu0 %v570_v15 }
  0x73   : > { %327 = vmatpush1.bf16.msra.mxu0 %v572_v16 }
  0x76   : > { %345 = vmatmul.mubr.bf16.vlgmr.msra.gmra.mrb[0].mxu0 %v203_v18 }
 0x149   : > { %v346_v24 = vpop.f32.mrb[0].mxu0 }
 0x14a   : > { %v348_v25 = vpop.f32.mrb[1].mxu0  ;;  %v347_v34 = vadd.f32 %v346_v24, %v225_v32 }
 0x14b   : > { %v349_v26 = vadd.f32 %v348_v25, %v229_v23  ;;  %v350_v27 = vpop.f32.mrb[2].mxu0 }
 0x14c   : > { %v351_v28 = vpop.f32.mrb[3].mxu0  ;;  %v353_v35 = vmax.f32 %v347_v34, 0.0 }
 0x14d   : > { %v484_v29 = vmul.f32 -1.442695, %v349_v26 }
 0x14e   : > { %v360_v36 = vsub.f32 %v353_v35, %v202_v17 }
 0x14f   : > { %573 = vpow2.f32 %v484_v29 }
 0x159   : > { %v574_v31 = vpop.eup %573 }
 0x15a   : > { %v357_v33 = vadd.f32 1.0, %v574_v31 }
 0x15c   : > { %575 = vrcp.f32 %v357_v33 }
 0x166   : > { %v576_v37 = vpop.eup %575 }
 0x167   : > { %v361_v38 = vmul.f32 %v576_v37, %v360_v36 }
 0x169   : > { %v362_v39 = vadd.f32 %v361_v38, %v202_v17 }
 0x16b   : > { %363 = vst [vmem:[%s200_s25] sm:$0xff] %v362_v39 }
 0x16c   : > { %648 = shalt.err (!%p645_p7)
}
 0x16d   : > { %s649_s29 = scalar_lea.hbm %s895_s9, 128  ;;  %s653_s22 = scalar_lea.hbm %s942_s3, 256 }
 0x16e   : > { %p650_p9 = scmp.ne.s32.totalorder %s895_s9, %s649_s29  ;;  %p654_p0 = scmp.lt.u32.totalorder %s895_s9, %s942_s3 }
 0x16f   : > { %p655_p11 = scmp.lt.u32.totalorder %s653_s22, %s649_s29  ;;  %p657_p4 = scmp.lt.u32.totalorder %s649_s29, %s895_s9 }
 0x170   : > { %p651_p2 = pnand %p650_p9, %p824_p12 }
 0x171   : > { %p656_p1 = por %p655_p11, %p654_p0 }
 0x172   : > { %p652_p5 = pneg %p651_p2 }
 0x173   : > { %p658_p6 = por %p657_p4, %p656_p1 }
 0x175   : > { %p659_p8 = pnand %p658_p6, %p652_p5 }
 0x177   : > { %662 = shalt.err (!%p659_p8)
}
 0x178   : > { %495 = dma.vmem_to_hbm [thread:$0]  (%p824_p12), %s897_s26, 128, %s895_s9, %s365_s10  }
 0x179 PF: > { %s390_s18 = sand.u32 1, %s693_s12   ;;  %p957_p10 = scmp.ne.s32.totalorder %s947_s19, 0 }
 0x17a   : > { %p958_p13 = scmp.ge.s32.totalorder %s705_s15, 2  ;;  %s391_s20 = scalar_lea.sflag [#allocation4], %s390_s18 }
 0x17c   : > { %p506_p3 = pnand %p958_p13, %p957_p10 }
 0x17e   : > { %688 = dma.done.wait (!%p506_p3), %s391_s20, 128  }
 0x17f   : > { %690 = vsyncadd (!%p506_p3), %s391_s20, 4294967168  ;;  %p17_p7 = scmp.ge.s32.totalorder %s789_s24, 4   ;;  %s959_s12 = smov %s697_s13 }
 0x180   : > { %s960_s13 = smov %s701_s14  ;;  %s961_s14 = smov %s820_s17 }
 0x181   : > { %s962_s15 = smov %s789_s24  ;;  %19 = sbr.rel (!%p17_p7) target bundleno = 6 (0x6), region = 81 }
 0x188   :  { %396 = vsyncpa [#allocation3], 1 }
 0x189   :  { %398 = vsyncpa [#allocation3 + $0x1], 1 }
 0x18a   :  { %399 = vsyncpa [#allocation6], 1 }
 0x18b   :  { %400 = vsyncpa [#allocation4], 1 }
 0x18c   :  { %402 = vsyncpa [#allocation4 + $0x1], 1 }

</bundles_post_ra>
